<compile_context>
chip_gen: v7x
topology: tpu7x:2x2x1
jax: 0.10.0
libtpu: 0.0.40
codegen_flags: <defaults>
</compile_context>

<pallas_src>
import jax
import jax.numpy as jnp
from jax.experimental import pallas as pl
from jax.experimental.pallas import tpu as pltpu

OUT_FEATURES = 16                       # nn.Linear(static_feature_dim, 16)
ROW_PACK = 8                            # batch rows packed per 128-lane output row
LANES = ROW_PACK * OUT_FEATURES         # 128
TB_ROWS = 32768                         # batch rows per grid step (multiple of 8)
                                        #   -> 4096 packed rows, ~12 MiB dbl-buffered


def _round_up(n: int, m: int) -> int:
    return ((n + m - 1) // m) * m


def prepare_params(weight, bias):
    """Pack PyTorch-layout params once (hoisted out of the per-call path).

    weight: [16, D] (out_features x in_features), bias: [16]
    returns (w_big [8*D, 128] bf16, b_big [1, 128] f32, w_t [D, 16] f32, b [16] f32).
    w_big / b_big feed the packed Pallas kernel; w_t / b feed the tiny ragged-tail
    epilogue.
    """
    w_t = weight.T.astype(jnp.float32)                                    # [D, 16]
    w_big = jnp.kron(jnp.eye(ROW_PACK, dtype=jnp.float32), w_t)           # [8*D, 128]
    w_big = w_big.astype(jnp.bfloat16)                                    # bf16 MXU operand
    b_f32 = bias.astype(jnp.float32)
    b_big = jnp.tile(b_f32, ROW_PACK).reshape(1, LANES)                   # [1, 128] f32
    return w_big, b_big, w_t, b_f32


def _packed_linear_relu_kernel(x_ref, w_ref, b_ref, o_ref):
    # x_ref: [tr, 8*D] f32, w_ref: [8*D, 128] bf16, b_ref: [1, 128] f32,
    # o_ref: [tr, 128] f32.
    x_bf16 = x_ref[...].astype(jnp.bfloat16)           # bf16 MXU operands, f32 accumulate
    y = jnp.dot(x_bf16, w_ref[...], preferred_element_type=jnp.float32)
    o_ref[...] = jnp.maximum(y + b_ref[...], 0.0).astype(o_ref.dtype)


@jax.jit
def idea_static_layer(x, w_big, b_big, w_t, b):
    """relu(x @ W^T + b) with (W, b) pre-packed by prepare_params.

    x: [B, D] float32  ->  [B, 16] float32
    """
    B, D = x.shape
    b_main = (B // ROW_PACK) * ROW_PACK            # 8-row-aligned prefix length

    outs = []

    if b_main > 0:
        rows = b_main // ROW_PACK
        # Row-major bitcast: 8 batch rows per packed slab row (no data movement).
        xp = x[:b_main].reshape(rows, ROW_PACK * D)

        # Tile selection: as large as VMEM allows, but >= 2 grid steps for big
        # batches so v7x megacore gets both TensorCores busy.
        tr_cap = TB_ROWS // ROW_PACK                               # 4096 packed rows
        tr = min(tr_cap, _round_up(pl.cdiv(rows, 2), ROW_PACK))
        if tr >= rows:
            tr = rows                                              # single full-array block
        grid = (pl.cdiv(rows, tr),)

        cost = pl.CostEstimate(
            flops=2 * b_main * D * OUT_FEATURES,
            transcendentals=0,
            bytes_accessed=4 * (b_main * D + b_main * OUT_FEATURES)
                           + 2 * w_big.size + 4 * b_big.size,
        )

        main_out = pl.pallas_call(
            _packed_linear_relu_kernel,
            out_shape=jax.ShapeDtypeStruct((rows, LANES), jnp.float32),
            grid_spec=pltpu.PrefetchScalarGridSpec(
                num_scalar_prefetch=0,
                grid=grid,
                in_specs=[
                    pl.BlockSpec((tr, ROW_PACK * D), lambda i: (i, 0)),
                    pl.BlockSpec((ROW_PACK * D, LANES), lambda i: (0, 0)),
                    pl.BlockSpec((1, LANES), lambda i: (0, 0)),
                ],
                out_specs=pl.BlockSpec((tr, LANES), lambda i: (i, 0)),
            ),
            compiler_params=pltpu.CompilerParams(
                dimension_semantics=("parallel",),        # batch tiles are independent
                vmem_limit_bytes=32 * 1024 * 1024,        # covers ~12 MiB working set
            ),
            cost_estimate=cost,
        )(xp, w_big, b_big)

        # Unpack the lane-dense slab back to [b_main, 16] (row-major bitcast).
        outs.append(main_out.reshape(b_main, OUT_FEATURES))

    if b_main < B:
        # <= 7 leftover rows: tiny f32 epilogue instead of padding/copying all of x.
        tail = x[b_main:]
        outs.append(jnp.maximum(tail @ w_t + b, 0.0))

    return outs[0] if len(outs) == 1 else jnp.concatenate(outs, axis=0)


if __name__ == "__main__":
    key = jax.random.PRNGKey(0)
    k_w, k_b, k_x1, k_x2 = jax.random.split(key, 4)

    static_feature_dim = 32

    # Deterministic parameter init (uniform, roughly matching nn.Linear's scale).
    bound = 1.0 / (static_feature_dim ** 0.5)
    weight = jax.random.uniform(
        k_w, (OUT_FEATURES, static_feature_dim), jnp.float32, -bound, bound)
    bias = jax.random.uniform(k_b, (OUT_FEATURES,), jnp.float32, -bound, bound)

    params = prepare_params(weight, bias)

    def ref_fn(x):
        return jnp.maximum(x @ weight.T + bias, 0.0)

    # Aligned small batch (2 packed slab rows).
    x1 = jax.random.normal(k_x1, (16, static_feature_dim), jnp.float32)
    out1 = jax.block_until_ready(idea_static_layer(x1, *params))
    assert out1.shape == (16, OUT_FEATURES)
    # bf16 MXU operands with f32 accumulation -> ~1e-3 abs error vs f32 reference.
    assert jnp.allclose(out1, ref_fn(x1), atol=1e-2, rtol=1e-2)

    # Ragged batch (exercises the aligned-prefix kernel + jnp tail epilogue).
    x2 = jax.random.normal(k_x2, (13, static_feature_dim), jnp.float32)
    out2 = jax.block_until_ready(idea_static_layer(x2, *params))
    assert out2.shape == (13, OUT_FEATURES)
    assert jnp.allclose(out2, ref_fn(x2), atol=1e-2, rtol=1e-2)

    print("KERNEL_OK")
</pallas_src>

<mosaic_0001>
module attributes {stable_mosaic.version = 11 : i64} {
  func.func @_packed_linear_relu_kernel(%arg0: i32, %arg1: memref<2x256xf32, #tpu.memory_space<vmem>>, %arg2: memref<256x128xbf16, #tpu.memory_space<vmem>>, %arg3: memref<1x128xf32, #tpu.memory_space<vmem>>, %arg4: memref<2x128xf32, #tpu.memory_space<vmem>>) attributes {dimension_semantics = [#tpu.dimension_semantics<parallel>], iteration_bounds = array<i64: 1>, scalar_prefetch = 0 : i64, scratch_operands = 0 : i64, tpu.core_type = #tpu.core_type<tc>, window_params = [{transform_indices = @transform_0, window_bounds = array<i64: 2, 256>}, {pipeline_mode = #tpu.pipeline_mode<synchronous>, transform_indices = @transform_1, window_bounds = array<i64: 256, 128>}, {pipeline_mode = #tpu.pipeline_mode<synchronous>, transform_indices = @transform_2, window_bounds = array<i64: 1, 128>}, {transform_indices = @transform_3, window_bounds = array<i64: 2, 128>}]} {
    %c0 = arith.constant 0 : index
    %c0_0 = arith.constant 0 : index
    %0 = vector.load %arg1[%c0, %c0_0] : memref<2x256xf32, #tpu.memory_space<vmem>>, vector<2x256xf32>
    %1 = arith.truncf %0 : vector<2x256xf32> to vector<2x256xbf16>
    %c0_1 = arith.constant 0 : index
    %c0_2 = arith.constant 0 : index
    %2 = vector.load %arg2[%c0_1, %c0_2] : memref<256x128xbf16, #tpu.memory_space<vmem>>, vector<256x128xbf16>
    %cst = arith.constant dense<0.000000e+00> : vector<2x128xf32>
    %3 = tpu.matmul %1, %2, %cst {dimension_numbers = #tpu.dot_dimension_numbers<[1], [0], [0], [1], [0, 0, 1, 1], [], []>} : vector<2x256xbf16>, vector<256x128xbf16>, vector<2x128xf32> -> vector<2x128xf32>
    %c0_3 = arith.constant 0 : index
    %c0_4 = arith.constant 0 : index
    %4 = vector.load %arg3[%c0_3, %c0_4] : memref<1x128xf32, #tpu.memory_space<vmem>>, vector<1x128xf32>
    %5 = vector.broadcast %4 : vector<1x128xf32> to vector<2x128xf32>
    %6 = arith.addf %3, %5 : vector<2x128xf32>
    %cst_5 = arith.constant 0.000000e+00 : f32
    %7 = vector.broadcast %cst_5 : f32 to vector<2x128xf32>
    %8 = arith.maximumf %6, %7 : vector<2x128xf32>
    %c0_6 = arith.constant 0 : index
    %c0_7 = arith.constant 0 : index
    %9 = vector.load %arg4[%c0_6, %c0_7] : memref<2x128xf32, #tpu.memory_space<vmem>>, vector<2x128xf32>
    tpu.vector_store %arg4[%c0_6, %c0_7], %8 {strides = array<i32>} : memref<2x128xf32, #tpu.memory_space<vmem>>, vector<2x128xf32>,
    return
  }
  func.func @transform_0(%arg0: i32) -> (i32, i32) {
    %c0_i32 = arith.constant 0 : i32
    %c0_i32_0 = arith.constant 0 : i32
    return %arg0, %c0_i32 : i32, i32
  }
  func.func @transform_1(%arg0: i32) -> (i32, i32) {
    %c0_i32 = arith.constant 0 : i32
    %c0_i32_0 = arith.constant 0 : i32
    %c0_i32_1 = arith.constant 0 : i32
    return %c0_i32, %c0_i32_0 : i32, i32
  }
  func.func @transform_2(%arg0: i32) -> (i32, i32) {
    %c0_i32 = arith.constant 0 : i32
    %c0_i32_0 = arith.constant 0 : i32
    %c0_i32_1 = arith.constant 0 : i32
    return %c0_i32, %c0_i32_0 : i32, i32
  }
  func.func @transform_3(%arg0: i32) -> (i32, i32) {
    %c0_i32 = arith.constant 0 : i32
    %c0_i32_0 = arith.constant 0 : i32
    return %arg0, %c0_i32 : i32, i32
  }
}

</mosaic_0001>

<bundles_post_ra>
// kernel: idea_static_layer.1
= control target key start
LH: loop header
LB: loop body
LE: loop exit
PB: predicated region body
PF: predicated region fallthrough
CT: control target
= control target key end

     0   :  { %8 = vsyncpa [#allocation3], 0  ;;  %s308_s12 = smov [#allocation2]   ;;  %s352_s0 = inlined_call_operand.vmem [shape: f32[2,256], index: 0, kind: input, shape index: {}]   ;;  %s353_s1 = inlined_call_operand.hbm [shape: bf16[256,128], index: 1, kind: input, shape index: {}]   ;;  %s354_s2 = inlined_call_operand.vmem [shape: f32[1,128], index: 2, kind: input, shape index: {}]   ;;  %s355_s3 = inlined_call_operand.vmem [shape: f32[2,128], index: 3, kind: output, shape index: {}]  }
   0x1   :  { %s16_s13 = sshll.u32 %s308_s12, 4  ;;  %s284_s16 = scalar_lea.hbm %s353_s1, 2048  ;;  %s17_s13 = int_to_ptr.vmem [resolvable:$true] %s16_s13 }
   0x2   :  { %p285_p0 = scmp.ne.s32.totalorder %s353_s1, %s284_s16  ;;  %p288_p1 = scmp.lt.u32.totalorder %s284_s16, %s353_s1 }
   0x4   :  { %p290_p2 = pnand %p288_p1, %p285_p0 }
   0x6   :  { %293 = shalt.err (!%p290_p2)
}
   0x7   :  { %s294_s21 = scalar_lea.vmem %s17_s13, 2048  ;;  %p299_p4 = scmp.lt.s32.totalorder %s17_s13, %s17_s13 }
   0x8   :  { %p295_p3 = scmp.ne.s32.totalorder %s17_s13, %s294_s21  ;;  %p300_p5 = scmp.lt.s32.totalorder %s294_s21, %s294_s21 }
   0xa   :  { %p301_p6 = por %p300_p5, %p299_p4 }
   0xc   :  { %p302_p7 = pnand %p301_p6, %p295_p3 }
   0xe   :  { %305 = shalt.err (!%p302_p7)
}
   0xf   :  { %s309_s22 = smov 64   ;;  %s310_s23 = smov 4  }
  0x10   :  { %22 = dma.hbm_to_vmem [thread:$0]  %s353_s1, 2048, %s17_s13, [#allocation3], %s309_s22, %s309_s22, %s310_s23  }
  0x11   :  { %306 = dma.done.wait [#allocation3], 2048  }
  0x12   :  { %307 = vsyncadd [#allocation3], 4294965248  ;;  %v268_v0 = vld [vmem:[#allocation2 + $0x40] sm:$0xff]   ;;  %v270_v2 = vld [vmem:[#allocation2 + $0x48] sm:$0xff]  }
  0x13   :  { %v269_v1 = vld [vmem:[#allocation2] sm:$0xff]   ;;  %243 = vmatprep.subr.bf16.mxu0 %v268_v0  ;;  %v271_v3 = vld [vmem:[#allocation2 + $0x8] sm:$0xff]   ;;  %v272_v4 = vld [vmem:[#allocation2 + $0x50] sm:$0xff]  }
  0x14   :  { %244 = vmatpush3.bf16.msra.mxu0 %v269_v1  ;;  %v273_v5 = vld [vmem:[#allocation2 + $0x10] sm:$0xff]   ;;  %v274_v6 = vld [vmem:[#allocation2 + $0x58] sm:$0xff]   ;;  %v276_v8 = vld [vmem:[#allocation2 + $0x60] sm:$0xff]  }
  0x15   :  { %245 = vmatprep.subr.bf16.mxu0 %v270_v2  ;;  %v275_v7 = vld [vmem:[#allocation2 + $0x18] sm:$0xff]   ;;  %v277_v9 = vld [vmem:[#allocation2 + $0x20] sm:$0xff]   ;;  %v278_v10 = vld [vmem:[#allocation2 + $0x68] sm:$0xff]  }
  0x16   :  { %v225_v11 = vld.sshfl [vmem:[%s352_s0] sm:$0x33 pattern:$0x76325410]  ;;  %v279_v13 = vld [vmem:[#allocation2 + $0x28] sm:$0xff]   ;;  %v280_v15 = vld [vmem:[#allocation2 + $0x70] sm:$0xff]  }
  0x17   :  { %v38_v12 = vcombine.high %v225_v11, %v225_v11  ;;  %v281_v16 = vld [vmem:[#allocation2 + $0x30] sm:$0xff]   ;;  %v282_v17 = vld [vmem:[#allocation2 + $0x78] sm:$0xff]   ;;  %v41_v19 = vpack.c.bf16 %v225_v11, %v225_v11  ;;  %v226_v21 = vld [vmem:[%s354_s2] ss:$0 sm:$0xff] }
  0x18   :  { %246 = vmatpush3.bf16.msra.mxu0 %v271_v3  ;;  %v283_v18 = vld [vmem:[#allocation2 + $0x38] sm:$0xff]  }
  0x19   :  { %247 = vmatprep.subr.bf16.mxu0 %v272_v4  ;;  %v42_v14 = vpack.c.bf16 %v38_v12, %v38_v12 }
  0x1b   :  { %210 = vmatprep.mubr.bf16.mxu0 %v42_v14 }
  0x1c   :  { %248 = vmatpush3.bf16.msra.mxu0 %v273_v5 }
  0x1d   :  { %249 = vmatprep.subr.bf16.mxu0 %v274_v6 }
  0x20   :  { %250 = vmatpush3.bf16.msra.mxu0 %v275_v7 }
  0x21   :  { %251 = vmatprep.subr.bf16.mxu0 %v276_v8 }
  0x24   :  { %252 = vmatpush3.bf16.msra.mxu0 %v277_v9 }
  0x25   :  { %253 = vmatprep.subr.bf16.mxu0 %v278_v10 }
  0x28   :  { %254 = vmatpush3.bf16.msra.mxu0 %v279_v13 }
  0x29   :  { %255 = vmatprep.subr.bf16.mxu0 %v280_v15 }
  0x2c   :  { %256 = vmatpush3.bf16.msra.mxu0 %v281_v16 }
  0x2d   :  { %257 = vmatprep.subr.bf16.mxu0 %v282_v17 }
  0x30   :  { %258 = vmatpush3.bf16.msra.mxu0 %v283_v18 }
  0x33   :  { %211 = vmatmul.mubr.bf16.vlgmr.msra.gmra.mrb[0].mxu0 %v41_v19 }
 0x106   :  { %v259_v20 = vpop.f32.mrb[0].mxu0 }
 0x107   :  { %v260_v22 = vpop.f32.mrb[1].mxu0 }
 0x108   :  { %v261_v23 = vadd.f32 %v260_v22, %v259_v20  ;;  %v262_v24 = vpop.f32.mrb[2].mxu0 }
 0x109   :  { %v263_v25 = vpop.f32.mrb[3].mxu0 }
 0x10a   :  { %v213_v26 = vadd.f32 %v261_v23, %v226_v21 }
 0x10c   :  { %v218_v27 = vmax.f32 %v213_v26, 0.0 }
 0x10e   :  { %219 = vst [vmem:[%s355_s3] sm:$0x3] %v218_v27 }
 0x10f   :  { %224 = vsyncpa [#allocation3], 1 }

</bundles_post_ra>
